<compile_context>
chip_gen: v6e
topology: v6e:2x2x1
jax: 0.10.0
libtpu: 0.0.40
codegen_flags: <defaults>
</compile_context>

<pallas_src>
import jax
import jax.numpy as jnp
from jax.experimental import pallas as pl
from jax.experimental.pallas import tpu as pltpu


def _round_up(x, m):
    return ((x + m - 1) // m) * m


def _pick_tile(dim_padded, candidates=(512, 256, 128)):
    """Largest standard tile that divides the (128-aligned) padded dim."""
    for c in candidates:
        if dim_padded % c == 0:
            return c
    return dim_padded


def _agg_bp_appr_kernel(w_ref, a_ref, xk_ref, xr_ref, o_ref, acc_ref):
    """o = x + w * (A @ x); K-tiled reduction with an f32 VMEM accumulator."""
    k = pl.program_id(2)

    @pl.when(k == 0)
    def _init():
        acc_ref[...] = jnp.zeros_like(acc_ref)

    # MXU: accumulate this K-slab of the adjacency matmul in f32.
    # A is bf16, x is f32; jnp.dot promotes and accumulates in f32.
    acc_ref[...] += jnp.dot(
        a_ref[...],
        xk_ref[...],
        preferred_element_type=jnp.float32,
    )

    @pl.when(k == pl.num_programs(2) - 1)
    def _finalize():
        w = w_ref[0]  # runtime scalar from SMEM (no recompile per weight value)
        o_ref[...] = (
            xr_ref[...].astype(jnp.float32) + w * acc_ref[...]
        ).astype(o_ref.dtype)


def agg_bp_appr(x, edge_index, weight):
    """Pallas implementation of AGG_BP_APPR.forward.

    x:          [N, F] float node features
    edge_index: [2, E] int32, row 0 = source nodes (x_j), row 1 = target nodes
    weight:     python float or scalar array (the module's `constant`)
    """
    N, F = x.shape
    src = edge_index[0]
    dst = edge_index[1]

    # Pad node & feature dims to multiples of 128 -> lane-dense, (8,128)-legal blocks.
    n_pad = _round_up(max(N, 128), 128)
    f_pad = _round_up(max(F, 128), 128)

    tm = _pick_tile(n_pad)  # destination-node (output-row) tile
    tk = _pick_tile(n_pad)  # source-node (reduction) tile
    tn = _pick_tile(f_pad)  # feature tile (lane dim, >= 128)

    # Dense adjacency (dst <- src). Built in f32 so multi-edge counts are exact,
    # then cast to bf16 (exact up to 256 duplicate edges) to halve A's HBM read.
    # NOTE: this O(N^2) scatter is wrapper glue; in real use, build/cache it once
    # per graph rather than per forward call.
    a = (
        jnp.zeros((n_pad, n_pad), jnp.float32)
        .at[dst, src]
        .add(1.0)
        .astype(jnp.bfloat16)
    )

    x_p = jnp.zeros((n_pad, f_pad), x.dtype).at[:N, :F].set(x)
    w_arr = jnp.asarray(weight, dtype=jnp.float32).reshape((1,))

    grid = (n_pad // tm, f_pad // tn, n_pad // tk)

    itemsize = jnp.dtype(x.dtype).itemsize
    cost = pl.CostEstimate(
        flops=2 * n_pad * n_pad * f_pad,
        transcendentals=0,
        bytes_accessed=(
            a.size * 2                      # bf16 adjacency
            + 2 * x_p.size * itemsize       # x read as RHS and as residual
            + n_pad * f_pad * itemsize      # output
        ),
    )

    y_p = pl.pallas_call(
        _agg_bp_appr_kernel,
        out_shape=jax.ShapeDtypeStruct((n_pad, f_pad), x.dtype),
        grid_spec=pltpu.PrefetchScalarGridSpec(
            num_scalar_prefetch=0,
            grid=grid,
            in_specs=[
                # weight: whole (1,) scalar array resident in SMEM.
                pl.BlockSpec(memory_space=pltpu.MemorySpace.SMEM),
                # A[dst, src] tile for (i, k).
                pl.BlockSpec((tm, tk), lambda i, j, k: (i, k)),
                # x as the matmul RHS: (src-tile, feature-tile).
                pl.BlockSpec((tk, tn), lambda i, j, k: (k, j)),
                # x as the residual: same tiling as the output, k-invariant
                # (stays resident in VMEM across the whole reduction).
                pl.BlockSpec((tm, tn), lambda i, j, k: (i, j)),
            ],
            out_specs=pl.BlockSpec((tm, tn), lambda i, j, k: (i, j)),
            scratch_shapes=[pltpu.VMEM((tm, tn), jnp.float32)],
        ),
        compiler_params=pltpu.CompilerParams(
            dimension_semantics=("parallel", "parallel", "arbitrary"),
            vmem_limit_bytes=64 * 1024 * 1024,
        ),
        cost_estimate=cost,
    )(w_arr, a, x_p, x_p)

    return y_p[:N, :F]


def _reference(x, edge_index, weight):
    """Pure-JAX reference mirroring the PyTorch/PyG semantics."""
    src = edge_index[0]
    dst = edge_index[1]
    msgs = x[src]                                                   # message(x_j) = x_j
    out = jax.ops.segment_sum(msgs, dst, num_segments=x.shape[0])   # aggr='add'
    return x + weight * out                                         # update + residual


if __name__ == "__main__":
    key = jax.random.PRNGKey(0)
    k_x, k_src, k_dst = jax.random.split(key, 3)

    N, F, E = 16, 32, 40          # nodes, feature dim, edges
    WEIGHT = 0.5                  # the module's `weight` / `constant`

    x = jax.random.normal(k_x, (N, F), dtype=jnp.float32)
    src = jax.random.randint(k_src, (E,), 0, N, dtype=jnp.int32)
    dst = jax.random.randint(k_dst, (E,), 0, N, dtype=jnp.int32)
    edge_index = jnp.stack([src, dst], axis=0)  # [2, E]

    y = agg_bp_appr(x, edge_index, WEIGHT)
    y = jax.block_until_ready(y)

    y_ref = _reference(x, edge_index, WEIGHT)
    assert y.shape == (N, F)
    assert jnp.allclose(y, y_ref, atol=1e-5, rtol=1e-5), "mismatch vs reference"

    print("KERNEL_OK")
</pallas_src>

<mosaic_0001>
module attributes {stable_mosaic.version = 11 : i64} {
  func.func @_agg_bp_appr_kernel(%arg0: i32, %arg1: i32, %arg2: i32, %arg3: memref<1xf32, #tpu.memory_space<smem>>, %arg4: memref<128x128xbf16, #tpu.memory_space<vmem>>, %arg5: memref<128x128xf32, #tpu.memory_space<vmem>>, %arg6: memref<128x128xf32, #tpu.memory_space<vmem>>, %arg7: memref<128x128xf32, #tpu.memory_space<vmem>>, %arg8: memref<128x128xf32, #tpu.memory_space<vmem>>) attributes {dimension_semantics = [#tpu.dimension_semantics<parallel>, #tpu.dimension_semantics<parallel>, #tpu.dimension_semantics<arbitrary>], iteration_bounds = array<i64: 1, 1, 1>, scalar_prefetch = 0 : i64, scratch_operands = 1 : i64, tpu.core_type = #tpu.core_type<tc>, window_params = [{transform_indices = @transform_0, window_bounds = array<i64: 1>}, {transform_indices = @transform_1, window_bounds = array<i64: 128, 128>}, {transform_indices = @transform_2, window_bounds = array<i64: 128, 128>}, {transform_indices = @transform_3, window_bounds = array<i64: 128, 128>}, {transform_indices = @transform_4, window_bounds = array<i64: 128, 128>}]} {
    %c0_i32 = arith.constant 0 : i32
    %0 = arith.cmpi eq, %arg2, %c0_i32 : i32
    %1 = arith.extui %0 : i1 to i32
    %c0_i32_0 = arith.constant 0 : i32
    %2 = arith.cmpi ne, %1, %c0_i32_0 : i32
    scf.if %2 {
      %cst_10 = arith.constant 0.000000e+00 : f32
      %12 = vector.broadcast %cst_10 : f32 to vector<128x128xf32>
      %c0_11 = arith.constant 0 : index
      %c0_12 = arith.constant 0 : index
      %13 = vector.load %arg8[%c0_11, %c0_12] : memref<128x128xf32, #tpu.memory_space<vmem>>, vector<128x128xf32>
      tpu.vector_store %arg8[%c0_11, %c0_12], %12 {strides = array<i32>} : memref<128x128xf32, #tpu.memory_space<vmem>>, vector<128x128xf32>,
    } else {
    }
    %c0 = arith.constant 0 : index
    %c0_1 = arith.constant 0 : index
    %3 = vector.load %arg8[%c0, %c0_1] : memref<128x128xf32, #tpu.memory_space<vmem>>, vector<128x128xf32>
    %c0_2 = arith.constant 0 : index
    %c0_3 = arith.constant 0 : index
    %4 = vector.load %arg4[%c0_2, %c0_3] : memref<128x128xbf16, #tpu.memory_space<vmem>>, vector<128x128xbf16>
    %c0_4 = arith.constant 0 : index
    %c0_5 = arith.constant 0 : index
    %5 = vector.load %arg5[%c0_4, %c0_5] : memref<128x128xf32, #tpu.memory_space<vmem>>, vector<128x128xf32>
    %cst = arith.constant dense<0.000000e+00> : vector<128x128xf32>
    %6 = tpu.matmul %4, %5, %cst {dimension_numbers = #tpu.dot_dimension_numbers<[1], [0], [0], [1], [0, 0, 1, 1], [], []>} : vector<128x128xbf16>, vector<128x128xf32>, vector<128x128xf32> -> vector<128x128xf32>
    %7 = arith.addf %3, %6 : vector<128x128xf32>
    %c0_6 = arith.constant 0 : index
    %c0_7 = arith.constant 0 : index
    %8 = vector.load %arg8[%c0_6, %c0_7] : memref<128x128xf32, #tpu.memory_space<vmem>>, vector<128x128xf32>
    tpu.vector_store %arg8[%c0_6, %c0_7], %7 {strides = array<i32>} : memref<128x128xf32, #tpu.memory_space<vmem>>, vector<128x128xf32>,
    %c0_i32_8 = arith.constant 0 : i32
    %9 = arith.cmpi eq, %arg2, %c0_i32_8 : i32
    %10 = arith.extui %9 : i1 to i32
    %c0_i32_9 = arith.constant 0 : i32
    %11 = arith.cmpi ne, %10, %c0_i32_9 : i32
    scf.if %11 {
      %c0_10 = arith.constant 0 : index
      %12 = memref.load %arg3[%c0_10] : memref<1xf32, #tpu.memory_space<smem>>
      %c0_11 = arith.constant 0 : index
      %c0_12 = arith.constant 0 : index
      %13 = vector.load %arg6[%c0_11, %c0_12] : memref<128x128xf32, #tpu.memory_space<vmem>>, vector<128x128xf32>
      %c0_13 = arith.constant 0 : index
      %c0_14 = arith.constant 0 : index
      %14 = vector.load %arg8[%c0_13, %c0_14] : memref<128x128xf32, #tpu.memory_space<vmem>>, vector<128x128xf32>
      %15 = vector.broadcast %12 : f32 to vector<128x128xf32>
      %16 = arith.mulf %15, %14 : vector<128x128xf32>
      %17 = arith.addf %13, %16 : vector<128x128xf32>
      %c0_15 = arith.constant 0 : index
      %c0_16 = arith.constant 0 : index
      %18 = vector.load %arg7[%c0_15, %c0_16] : memref<128x128xf32, #tpu.memory_space<vmem>>, vector<128x128xf32>
      tpu.vector_store %arg7[%c0_15, %c0_16], %17 {strides = array<i32>} : memref<128x128xf32, #tpu.memory_space<vmem>>, vector<128x128xf32>,
    } else {
    }
    return
  }
  func.func @transform_0(%arg0: i32, %arg1: i32, %arg2: i32) -> i32 {
    %c0_i32 = arith.constant 0 : i32
    %c0_i32_0 = arith.constant 0 : i32
    return %c0_i32 : i32
  }
  func.func @transform_1(%arg0: i32, %arg1: i32, %arg2: i32) -> (i32, i32) {
    %c0_i32 = arith.constant 0 : i32
    return %arg0, %arg2 : i32, i32
  }
  func.func @transform_2(%arg0: i32, %arg1: i32, %arg2: i32) -> (i32, i32) {
    %c0_i32 = arith.constant 0 : i32
    return %arg2, %arg1 : i32, i32
  }
  func.func @transform_3(%arg0: i32, %arg1: i32, %arg2: i32) -> (i32, i32) {
    %c0_i32 = arith.constant 0 : i32
    return %arg0, %arg1 : i32, i32
  }
  func.func @transform_4(%arg0: i32, %arg1: i32, %arg2: i32) -> (i32, i32) {
    %c0_i32 = arith.constant 0 : i32
    return %arg0, %arg1 : i32, i32
  }
}

</mosaic_0001>

<bundles_post_ra>
// kernel: tpu_custom_call.1
= control target key start
LH: loop header
LB: loop body
LE: loop exit
PB: predicated region body
PF: predicated region fallthrough
CT: control target
= control target key end

     0   :  { %10 = vsyncpa [#allocation5], 0  ;;  %s730_s0 = inlined_call_operand.<no memory space> [shape: f32[1], index: 0, kind: input, shape index: {}]   ;;  %s731_s1 = inlined_call_operand.hbm [shape: bf16[128,128], index: 1, kind: input, shape index: {}]   ;;  %s732_s2 = inlined_call_operand.hbm [shape: f32[128,128], index: 2, kind: input, shape index: {}]   ;;  %s733_s3 = inlined_call_operand.hbm [shape: f32[128,128], index: 3, kind: input, shape index: {}]   ;;  %s734_s4 = inlined_call_operand.hbm [shape: f32[128,128], index: 4, kind: output, shape index: {}]  }
   0x1   :  { %11 = vsyncpa [#allocation8], 0 }
   0x2   :  { %12 = vsyncpa [#allocation6], 0  ;;  %s655_s15 = smov [#allocation7]  }
   0x3   :  { %s32_s16 = sshll.u32 %s655_s15, 4  ;;  %s33_s16 = int_to_ptr.vmem [resolvable:$true] %s32_s16 }
   0x4   :  { %s577_s17 = scalar_lea.vmem %s33_s16, 2048  ;;  %p582_p1 = scmp.lt.s32.totalorder %s33_s16, %s33_s16 }
   0x5   :  { %p578_p0 = scmp.ne.s32.totalorder %s33_s16, %s577_s17  ;;  %p583_p2 = scmp.lt.s32.totalorder %s577_s17, %s577_s17 }
   0x7   :  { %p584_p3 = por %p583_p2, %p582_p1 }
   0x9   :  { %p585_p4 = pnand %p584_p3, %p578_p0 }
   0xb   :  { %588 = shalt.err (!%p585_p4)
}
   0xc   :  { %s656_s18 = smov 128   ;;  %s657_s19 = smov 8  }
   0xd   :  { %38 = dma.hbm_to_vmem [thread:$0]  %s732_s2, 2048, %s33_s16, [#allocation8], %s656_s18, %s656_s18, %s657_s19  }
   0xe   :  { %s658_s22 = smov [#allocation4]  }
   0xf   :  { %s20_s23 = sshll.u32 %s658_s22, 4  ;;  %s21_s23 = int_to_ptr.vmem [resolvable:$true] %s20_s23 }
  0x10   :  { %s597_s24 = scalar_lea.vmem %s21_s23, 1024  ;;  %p602_p6 = scmp.lt.s32.totalorder %s21_s23, %s21_s23 }
  0x11   :  { %p598_p5 = scmp.ne.s32.totalorder %s21_s23, %s597_s24  ;;  %p603_p7 = scmp.lt.s32.totalorder %s597_s24, %s597_s24 }
  0x13   :  { %p604_p8 = por %p603_p7, %p602_p6 }
  0x15   :  { %p605_p9 = pnand %p604_p8, %p598_p5 }
  0x17   :  { %608 = shalt.err (!%p605_p9)
}
  0x18   :  { %s659_s25 = smov 64   ;;  %s660_s26 = smov 4  }
  0x19   :  { %26 = dma.hbm_to_vmem [thread:$0]  %s731_s1, 1024, %s21_s23, [#allocation5], %s659_s25, %s659_s25, %s660_s26  }
  0x1a   :  { %s661_s29 = smov [#allocation9]  }
  0x1b   :  { %s44_s30 = sshll.u32 %s661_s29, 4  ;;  %s45_s30 = int_to_ptr.vmem [resolvable:$true] %s44_s30 }
  0x1c   :  { %s617_s2 = scalar_lea.vmem %s45_s30, 2048  ;;  %p622_p11 = scmp.lt.s32.totalorder %s45_s30, %s45_s30 }
  0x1d   :  { %p618_p10 = scmp.ne.s32.totalorder %s45_s30, %s617_s2  ;;  %p623_p12 = scmp.lt.s32.totalorder %s617_s2, %s617_s2 }
  0x1f   :  { %p624_p13 = por %p623_p12, %p622_p11 }
  0x21   :  { %p625_p0 = pnand %p624_p13, %p618_p10 }
  0x23   :  { %628 = shalt.err (!%p625_p0)
}
  0x24   :  { %50 = dma.hbm_to_vmem [thread:$0]  %s733_s3, 2048, %s45_s30, [#allocation8], %s656_s18, %s656_s18, %s657_s19  }
  0x25   :  { %649 = dma.done.wait [#allocation5], 1024  }
  0x26   :  { %650 = vsyncadd [#allocation5], 4294966272 }
  0x27   :  { %651 = dma.done.wait [#allocation8], 4096  }
  0x28   :  { %652 = vsyncadd [#allocation8], 4294963200  ;;  %v128_v0 = vld [vmem:[#allocation7 + $0x78] sm:$0xff]  ;;  %v127_v1 = vld [vmem:[#allocation7 + $0x70] sm:$0xff]  ;;  %v706_v24 = vstv %s730_s0  ;;  %s662_s0 = smov [#allocation10]  }
  0x29   :  { %473 = vmatprep.subr.mxu0 %v128_v0  ;;  %521 = vmatprep.subr.mxu1 %v128_v0  ;;  %v126_v2 = vld [vmem:[#allocation7 + $0x68] sm:$0xff]  ;;  %v125_v3 = vld [vmem:[#allocation7 + $0x60] sm:$0xff]  ;;  %v124_v4 = vld [vmem:[#allocation7 + $0x58] sm:$0xff]  ;;  %s428_s7 = sshll.u32 %s662_s0, 4  ;;  %s429_s7 = int_to_ptr.vmem [resolvable:$true] %s428_s7 }
  0x2a   :  { %474 = vmatpush3.msra.mxu0 %v128_v0  ;;  %537 = vmatpush3.msra.mxu1 %v128_v0  ;;  %v123_v5 = vld [vmem:[#allocation7 + $0x50] sm:$0xff]  ;;  %v122_v6 = vld [vmem:[#allocation7 + $0x48] sm:$0xff]  ;;  %v121_v7 = vld [vmem:[#allocation7 + $0x40] sm:$0xff]  ;;  %s629_s8 = scalar_lea.vmem %s429_s7, 2048  ;;  %p634_p2 = scmp.lt.s32.totalorder %s429_s7, %s429_s7 }
  0x2b   :  { %475 = vmatprep.subr.mxu0 %v127_v1  ;;  %522 = vmatprep.subr.mxu1 %v127_v1  ;;  %v120_v8 = vld [vmem:[#allocation7 + $0x38] sm:$0xff]  ;;  %v119_v9 = vld [vmem:[#allocation7 + $0x30] sm:$0xff]  ;;  %v118_v10 = vld [vmem:[#allocation7 + $0x28] sm:$0xff]  ;;  %p630_p1 = scmp.ne.s32.totalorder %s429_s7, %s629_s8  ;;  %p635_p3 = scmp.lt.s32.totalorder %s629_s8, %s629_s8 }
  0x2c   :  { %476 = vmatpush3.msra.mxu0 %v127_v1  ;;  %538 = vmatpush3.msra.mxu1 %v127_v1  ;;  %v117_v11 = vld [vmem:[#allocation7 + $0x20] sm:$0xff]  ;;  %v116_v12 = vld [vmem:[#allocation7 + $0x18] sm:$0xff]  ;;  %v115_v13 = vld [vmem:[#allocation7 + $0x10] sm:$0xff] }
  0x2d   :  { %477 = vmatprep.subr.mxu0 %v126_v2  ;;  %523 = vmatprep.subr.mxu1 %v126_v2  ;;  %v114_v14 = vld [vmem:[#allocation7 + $0x8] sm:$0xff]  ;;  %v113_v15 = vld [vmem:[#allocation7] sm:$0xff]  ;;  %v565_v20 = vld [vmem:[#allocation4 + $0x10] sm:$0xff]   ;;  %p636_p4 = por %p635_p3, %p634_p2 }
  0x2e   :  { %478 = vmatpush3.msra.mxu0 %v126_v2  ;;  %539 = vmatpush3.msra.mxu1 %v126_v2  ;;  %v561_v16 = vld [vmem:[#allocation4] sm:$0xff]   ;;  %v563_v18 = vld [vmem:[#allocation4 + $0x8] sm:$0xff]   ;;  %v566_v21 = vld [vmem:[#allocation4 + $0x30] sm:$0xff]  }
  0x2f   :  { %479 = vmatprep.subr.mxu0 %v125_v3  ;;  %524 = vmatprep.subr.mxu1 %v125_v3  ;;  %v562_v17 = vld [vmem:[#allocation4 + $0x20] sm:$0xff]   ;;  %v564_v19 = vld [vmem:[#allocation4 + $0x28] sm:$0xff]   ;;  %v567_v22 = vld [vmem:[#allocation4 + $0x18] sm:$0xff]   ;;  %p637_p5 = pnand %p636_p4, %p630_p1 }
  0x30   :  { %480 = vmatpush3.msra.mxu0 %v125_v3  ;;  %540 = vmatpush3.msra.mxu1 %v125_v3  ;;  %v568_v23 = vld [vmem:[#allocation4 + $0x38] sm:$0xff]   ;;  %v344_v26 = vld [vmem:[#allocation9 + $0x10] sm:$0xff]  ;;  %v342_v32 = vld [vmem:[#allocation9] sm:$0xff] }
  0x31   :  { %481 = vmatprep.subr.mxu0 %v124_v4  ;;  %525 = vmatprep.subr.mxu1 %v124_v4  ;;  %v352_v28 = vld [vmem:[#allocation9 + $0x50] sm:$0xff]  ;;  %v350_v34 = vld [vmem:[#allocation9 + $0x40] sm:$0xff]  ;;  %v345_v40 = vld [vmem:[#allocation9 + $0x18] sm:$0xff] }
  0x32   :  { %482 = vmatpush3.msra.mxu0 %v124_v4  ;;  %541 = vmatpush3.msra.mxu1 %v124_v4  ;;  %v353_v42 = vld [vmem:[#allocation9 + $0x58] sm:$0xff]  ;;  %v343_v48 = vld [vmem:[#allocation9 + $0x8] sm:$0xff]  ;;  %v348_v56 = vld [vmem:[#allocation9 + $0x30] sm:$0xff] }
  0x33   :  { %483 = vmatprep.subr.mxu0 %v123_v5  ;;  %526 = vmatprep.subr.mxu1 %v123_v5  ;;  %v351_v50 = vld [vmem:[#allocation9 + $0x48] sm:$0xff]  ;;  %v356_v58 = vld [vmem:[#allocation9 + $0x70] sm:$0xff]  ;;  %v346_v0 = vld [vmem:[#allocation9 + $0x20] sm:$0xff] }
  0x34   :  { %484 = vmatpush3.msra.mxu0 %v123_v5  ;;  %542 = vmatpush3.msra.mxu1 %v123_v5  ;;  %v354_v2 = vld [vmem:[#allocation9 + $0x60] sm:$0xff] }
  0x35   :  { %485 = vmatprep.subr.mxu0 %v122_v6  ;;  %527 = vmatprep.subr.mxu1 %v122_v6 }
  0x36   :  { %486 = vmatpush3.msra.mxu0 %v122_v6  ;;  %543 = vmatpush3.msra.mxu1 %v122_v6 }
  0x37   :  { %487 = vmatprep.subr.mxu0 %v121_v7  ;;  %528 = vmatprep.subr.mxu1 %v121_v7 }
  0x38   :  { %488 = vmatpush3.msra.mxu0 %v121_v7  ;;  %544 = vmatpush3.msra.mxu1 %v121_v7 }
  0x39   :  { %489 = vmatprep.subr.mxu0 %v120_v8  ;;  %529 = vmatprep.subr.mxu1 %v120_v8 }
  0x3a   :  { %490 = vmatpush3.msra.mxu0 %v120_v8  ;;  %545 = vmatpush3.msra.mxu1 %v120_v8  ;;  %v349_v8 = vld [vmem:[#allocation9 + $0x38] sm:$0xff] }
  0x3b   :  { %491 = vmatprep.subr.mxu0 %v119_v9  ;;  %530 = vmatprep.subr.mxu1 %v119_v9 }
  0x3c   :  { %492 = vmatpush3.msra.mxu0 %v119_v9  ;;  %546 = vmatpush3.msra.mxu1 %v119_v9 }
  0x3d   :  { %493 = vmatprep.subr.mxu0 %v118_v10  ;;  %531 = vmatprep.subr.mxu1 %v118_v10 }
  0x3e   :  { %494 = vmatpush3.msra.mxu0 %v118_v10  ;;  %547 = vmatpush3.msra.mxu1 %v118_v10  ;;  %v357_v10 = vld [vmem:[#allocation9 + $0x78] sm:$0xff] }
  0x3f   :  { %495 = vmatprep.subr.mxu0 %v117_v11  ;;  %532 = vmatprep.subr.mxu1 %v117_v11 }
  0x40   :  { %496 = vmatpush3.msra.mxu0 %v117_v11  ;;  %548 = vmatpush3.msra.mxu1 %v117_v11 }
  0x41   :  { %497 = vmatprep.subr.mxu0 %v116_v12  ;;  %533 = vmatprep.subr.mxu1 %v116_v12 }
  0x42   :  { %498 = vmatpush3.msra.mxu0 %v116_v12  ;;  %549 = vmatpush3.msra.mxu1 %v116_v12 }
  0x43   :  { %499 = vmatprep.subr.mxu0 %v115_v13  ;;  %534 = vmatprep.subr.mxu1 %v115_v13 }
  0x44   :  { %500 = vmatpush3.msra.mxu0 %v115_v13  ;;  %550 = vmatpush3.msra.mxu1 %v115_v13 }
  0x45   :  { %501 = vmatprep.subr.mxu0 %v114_v14  ;;  %535 = vmatprep.subr.mxu1 %v114_v14 }
  0x46   :  { %502 = vmatpush3.msra.mxu0 %v114_v14  ;;  %551 = vmatpush3.msra.mxu1 %v114_v14 }
  0x47   :  { %503 = vmatprep.subr.mxu0 %v113_v15  ;;  %536 = vmatprep.subr.mxu1 %v113_v15 }
  0x48   :  { %504 = vmatpush3.msra.mxu0 %v113_v15  ;;  %552 = vmatpush3.msra.mxu1 %v113_v15 }
  0x49   :  { %505 = vmatprep.mubr.bf16.mxu0 %v561_v16  ;;  %513 = vmatprep.mubr.bf16.mxu1 %v562_v17  ;;  %v347_v16 = vld [vmem:[#allocation9 + $0x28] sm:$0xff] }
  0x4a   :  { %506 = vmatmul.mubr.bf16.vlgmr.msra.gmra.mxu0 %v563_v18  ;;  %514 = vmatmul.mubr.bf16.vlgmr.msra.gmra.mxu1 %v564_v19  ;;  %v355_v18 = vld [vmem:[#allocation9 + $0x68] sm:$0xff] }
  0x4b   :  { %509 = vmatprep.mubr.bf16.mxu0 %v565_v20  ;;  %517 = vmatprep.mubr.bf16.mxu1 %v566_v21 }
  0x52   :  { %510 = vmatmul.mubr.bf16.gmra.mxu0 %v567_v22  ;;  %518 = vmatmul.mubr.bf16.gmra.mxu1 %v568_v23 }
 0x10a   :  { %v507_v25 = vpop.f32.mrf.mxu0  ;;  %v515_v27 = vpop.f32.mrf.mxu1 }
 0x10b   :  { %v377_v29 = vmul.f32 %v507_v25, %v706_v24  ;;  %v385_v30 = vmul.f32 %v515_v27, %v706_v24 }
 0x10c   :  { %v243_v31 = vpop.f32.mrf.mxu0  ;;  %v275_v33 = vpop.f32.mrf.mxu1 }
 0x10d   :  { %v393_v35 = vadd.f32 %v377_v29, %v344_v26  ;;  %v401_v36 = vadd.f32 %v385_v30, %v352_v28  ;;  %v375_v37 = vmul.f32 %v706_v24, %v243_v31  ;;  %v383_v38 = vmul.f32 %v706_v24, %v275_v33 }
 0x10e   :  { %v508_v39 = vpop.f32.mrf.mxu0  ;;  %v516_v41 = vpop.f32.mrf.mxu1 }
 0x10f   :  { %409 = vst [vmem:[#allocation10 + $0x10] sm:$0xff] %v393_v35  ;;  %417 = vst [vmem:[#allocation10 + $0x50] sm:$0xff] %v401_v36  ;;  %v391_v43 = vadd.f32 %v375_v37, %v342_v32  ;;  %v399_v44 = vadd.f32 %v383_v38, %v350_v34  ;;  %v378_v45 = vmul.f32 %v508_v39, %v706_v24 }
 0x110   :  { %v386_v46 = vmul.f32 %v516_v41, %v706_v24  ;;  %v246_v47 = vpop.f32.mrf.mxu0  ;;  %v278_v49 = vpop.f32.mrf.mxu1 }
 0x111   :  { %407 = vst [vmem:[#allocation10] sm:$0xff] %v391_v43  ;;  %415 = vst [vmem:[#allocation10 + $0x40] sm:$0xff] %v399_v44  ;;  %v394_v51 = vadd.f32 %v378_v45, %v345_v40  ;;  %v376_v53 = vmul.f32 %v706_v24, %v246_v47  ;;  %v384_v54 = vmul.f32 %v706_v24, %v278_v49 }
 0x112   :  { %v402_v52 = vadd.f32 %v386_v46, %v353_v42  ;;  %v511_v55 = vpop.f32.mrf.mxu0  ;;  %v519_v57 = vpop.f32.mrf.mxu1 }
 0x113   :  { %410 = vst [vmem:[#allocation10 + $0x18] sm:$0xff] %v394_v51  ;;  %v392_v59 = vadd.f32 %v376_v53, %v343_v48  ;;  %v400_v60 = vadd.f32 %v384_v54, %v351_v50  ;;  %v381_v61 = vmul.f32 %v511_v55, %v706_v24  ;;  %v389_v62 = vmul.f32 %v519_v57, %v706_v24 }
 0x114   :  { %418 = vst [vmem:[#allocation10 + $0x58] sm:$0xff] %v402_v52  ;;  %v259_v63 = vpop.f32.mrf.mxu0  ;;  %v291_v1 = vpop.f32.mrf.mxu1 }
 0x115   :  { %408 = vst [vmem:[#allocation10 + $0x8] sm:$0xff] %v392_v59  ;;  %416 = vst [vmem:[#allocation10 + $0x48] sm:$0xff] %v400_v60  ;;  %v397_v3 = vadd.f32 %v381_v61, %v348_v56  ;;  %v405_v4 = vadd.f32 %v389_v62, %v356_v58  ;;  %v379_v5 = vmul.f32 %v706_v24, %v259_v63 }
 0x116   :  { %v387_v6 = vmul.f32 %v706_v24, %v291_v1  ;;  %v512_v7 = vpop.f32.mrf.mxu0  ;;  %v520_v9 = vpop.f32.mrf.mxu1 }
 0x117   :  { %413 = vst [vmem:[#allocation10 + $0x30] sm:$0xff] %v397_v3  ;;  %421 = vst [vmem:[#allocation10 + $0x70] sm:$0xff] %v405_v4  ;;  %v395_v11 = vadd.f32 %v379_v5, %v346_v0  ;;  %v382_v13 = vmul.f32 %v512_v7, %v706_v24  ;;  %v390_v14 = vmul.f32 %v520_v9, %v706_v24 }
 0x118   :  { %v403_v12 = vadd.f32 %v387_v6, %v354_v2  ;;  %v262_v15 = vpop.f32.mrf.mxu0  ;;  %v294_v17 = vpop.f32.mrf.mxu1 }
 0x119   :  { %411 = vst [vmem:[#allocation10 + $0x20] sm:$0xff] %v395_v11  ;;  %v398_v19 = vadd.f32 %v382_v13, %v349_v8  ;;  %v406_v20 = vadd.f32 %v390_v14, %v357_v10  ;;  %v380_v21 = vmul.f32 %v706_v24, %v262_v15  ;;  %v388_v22 = vmul.f32 %v706_v24, %v294_v17 }
 0x11a   :  { %419 = vst [vmem:[#allocation10 + $0x60] sm:$0xff] %v403_v12 }
 0x11b   :  { %414 = vst [vmem:[#allocation10 + $0x38] sm:$0xff] %v398_v19  ;;  %422 = vst [vmem:[#allocation10 + $0x78] sm:$0xff] %v406_v20  ;;  %v396_v23 = vadd.f32 %v380_v21, %v347_v16  ;;  %v404_v25 = vadd.f32 %v388_v22, %v355_v18 }
 0x11d   :  { %412 = vst [vmem:[#allocation10 + $0x28] sm:$0xff] %v396_v23  ;;  %420 = vst [vmem:[#allocation10 + $0x68] sm:$0xff] %v404_v25 }
 0x11e   :  { %640 = shalt.err (!%p637_p5)
}
 0x11f   :  { %434 = dma.vmem_to_hbm [thread:$0]  %s429_s7, 2048, %s734_s4, [#allocation6], %s656_s18, %s656_s18, %s657_s19  }
 0x120   :  { %653 = dma.done.wait [#allocation6], 2048  }
 0x121   :  { %654 = vsyncadd [#allocation6], 4294965248 }
 0x122   :  { %438 = vsyncpa [#allocation5], 1 }
 0x123   :  { %439 = vsyncpa [#allocation8], 1 }
 0x124   :  { %440 = vsyncpa [#allocation6], 1 }

</bundles_post_ra>
